<compile_context>
chip_gen: v7x
topology: tpu7x:2x2x1
jax: 0.10.0
libtpu: 0.0.40
codegen_flags: <defaults>
</compile_context>

<pallas_src>
import functools

import numpy as np
import jax
import jax.numpy as jnp
from jax.experimental import pallas as pl
from jax.experimental.pallas import tpu as pltpu


# -----------------------------------------------------------------------------
# Pallas kernel: full forward pass, single grid point (everything is tiny).
# -----------------------------------------------------------------------------
def _hier_kernel(x_ref, w_ref, wqkv_ref, aux_ref, out_ref, *, meta):
    f32, bf16 = jnp.float32, jnp.bfloat16
    B = x_ref.shape[0]
    off = meta["w_off"]  # name -> row offset of a 128-row block in the bf16 slab

    def w(name):
        o = off[name]
        return w_ref[o:o + 128, :]                    # (128, 128) bf16, lane-dense

    def nbias(row):
        return aux_ref[row:row + 1, 0:128]            # (1, 128) f32

    # stage 1: block-diagonal encoder first layers + ReLU (Dropout = identity, eval mode)
    h1 = jnp.maximum(
        jnp.dot(x_ref[...].astype(bf16), w("W1"), preferred_element_type=f32) + nbias(1),
        0.0)                                          # (B, 128); lanes 96:128 are 0

    # stage 2: ONE wide MXU pass = encoder-2nd-layer ∘ {Q, 3 rotated K, 3 rotated V}
    # (W2 folded into every projection at prep time; 1/sqrt(head_dim) folded into Q).
    qkv = jnp.dot(h1.astype(bf16), wqkv_ref[...], preferred_element_type=f32) \
        + aux_ref[0:1, :]                             # (B, 896) f32
    q = qkv[:, 0:128]
    k0, k1, k2 = (qkv[:, 128 * (1 + d):128 * (2 + d)] for d in range(3))
    v0, v1, v2 = (qkv[:, 128 * (4 + d):128 * (5 + d)] for d in range(3))

    # stage 3: attention scores — row-stack the 3 key rotations (sublane axis) and do ONE
    # bf16 dot with the 0/1 head-segment matrix (segmented per-head lane reduction).
    qk = jnp.concatenate([q * k0, q * k1, q * k2], axis=0)          # (3B, 128)
    sc = jnp.dot(qk.astype(bf16), w("seg"), preferred_element_type=f32)
    s0, s1, s2 = sc[0:B], sc[B:2 * B], sc[2 * B:3 * B]
    m = jnp.maximum(jnp.maximum(s0, s1), s2)
    e0, e1, e2 = jnp.exp(s0 - m), jnp.exp(s1 - m), jnp.exp(s2 - m)
    inv = pl.reciprocal(e0 + e1 + e2, approx=True)                  # EUP slot, ~free

    # stage 4: broadcast probs back to the E lanes of each head (ONE bf16 dot with seg^T),
    # then the weighted sum over the 3 (rotated) value arrangements.
    ep = jnp.concatenate([e0 * inv, e1 * inv, e2 * inv], axis=0)    # (3B, 128)
    pr = jnp.dot(ep.astype(bf16), w("segT"), preferred_element_type=f32)
    attn = pr[0:B] * v0 + pr[B:2 * B] * v1 + pr[2 * B:3 * B] * v2   # (B, 128)

    # stage 5: fusion MLP layer 1 (attention out-proj Wo folded in) + ReLU
    fh = jnp.maximum(
        jnp.dot(attn.astype(bf16), w("U1"), preferred_element_type=f32) + nbias(2),
        0.0)
    # stage 6: fused (agent_score | performance) head (fusion layer 2 folded in),
    # lane-dense (B, 128) store; sliced outside the kernel.
    out_ref[...] = jnp.dot(fh.astype(bf16), w("Whead"), preferred_element_type=f32) + nbias(3)


# -----------------------------------------------------------------------------
# Parameter fusion + packing (done once, outside the hot path).  All folds are
# exact linear-algebra identities performed in f32, cast to bf16 once.
# -----------------------------------------------------------------------------
def prepare_packed_params(params, text_dim, metric_dim, feedback_dim, hidden_dims, num_heads):
    h0, E, h2, h3 = hidden_dims
    H = num_heads
    assert E % H == 0, "hidden_dims[1] must be divisible by num_heads"
    dh = E // H
    scale = 1.0 / float(np.sqrt(dh))
    Din = text_dim + metric_dim + feedback_dim
    assert Din <= 128 and 3 * h0 <= 128 and 3 * E <= 128 and h2 <= 128 and h3 <= 128
    assert 1 + metric_dim <= 128

    p = {k: np.asarray(v, np.float32) for k, v in params.items()}

    # ---- stage 1: block-diagonal encoder first layer (x -> h1, ReLU in kernel) ------
    W1 = np.zeros((128, 128), np.float32)
    b1 = np.zeros((1, 128), np.float32)
    ro = 0
    for m, (wk_, bk_) in enumerate([(p["tw1"], p["tb1"]),
                                    (p["mw1"], p["mb1"]),
                                    (p["fw1"], p["fbb1"])]):
        W1[ro:ro + wk_.shape[0], m * h0:(m + 1) * h0] = wk_
        b1[0, m * h0:(m + 1) * h0] = bk_
        ro += wk_.shape[0]

    # ---- fold encoder 2nd layer (W2) into Q/K/V (no nonlinearity between -> exact) --
    W2s = [p["tw2"], p["mw2"], p["fw2"]]
    b2s = [p["tb2"], p["mb2"], p["fbb2"]]
    Wq_f = [(W2s[m] @ p["wq"]) * scale for m in range(3)]            # (h0, E)
    bq_f = [(b2s[m] @ p["wq"] + p["bq"]) * scale for m in range(3)]  # (1, E)
    Wk_f = [W2s[m] @ p["wk"] for m in range(3)]
    bk_f = [b2s[m] @ p["wk"] + p["bk"] for m in range(3)]
    Wv_f = [W2s[m] @ p["wv"] for m in range(3)]
    bv_f = [b2s[m] @ p["wv"] + p["bv"] for m in range(3)]

    def rot_block(Wf, bf, rot, diag=False):
        # lane block c of the output holds modality r = (c+rot)%3 (or c if diag),
        # projected from modality r's slice of h1.
        W = np.zeros((128, 128), np.float32)
        b = np.zeros((1, 128), np.float32)
        for c in range(3):
            r = c if diag else (c + rot) % 3
            W[r * h0:(r + 1) * h0, c * E:(c + 1) * E] = Wf[r]
            b[0, c * E:(c + 1) * E] = bf[r]
        return W, b

    wide_blocks = [rot_block(Wq_f, bq_f, 0, diag=True)]
    wide_blocks += [rot_block(Wk_f, bk_f, d) for d in range(3)]
    wide_blocks += [rot_block(Wv_f, bv_f, d) for d in range(3)]
    wqkv = np.zeros((128, 7 * 128), np.float32)
    bqkv = np.zeros((1, 7 * 128), np.float32)
    for i, (Wb, bb) in enumerate(wide_blocks):
        wqkv[:, i * 128:(i + 1) * 128] = Wb
        bqkv[:, i * 128:(i + 1) * 128] = bb

    # ---- fold attention out-proj (Wo) into fusion layer 1 (exact) --------------------
    U1f = np.zeros((128, 128), np.float32)
    for c in range(3):
        U1f[c * E:(c + 1) * E, :h2] = p["wo"] @ p["uw1"][c * E:(c + 1) * E, :]
    bU1 = np.zeros((1, 128), np.float32)
    bU1[0, :h2] = np.tile(p["bo"], (1, 3)) @ p["uw1"] + p["ub1"]

    # ---- fold fusion layer 2 (U2) into the fused (agent|perf) head (exact) -----------
    W_head = np.zeros((h3, 128), np.float32)
    W_head[:, 0:1] = p["sw"]
    W_head[:, 1:1 + metric_dim] = p["pw"]
    b_head = np.zeros((1, 128), np.float32)
    b_head[0, 0:1] = p["sb"]
    b_head[0, 1:1 + metric_dim] = p["pb"]
    Wheadf = np.zeros((128, 128), np.float32)
    Wheadf[:h2, :] = p["uw2"] @ W_head
    bheadf = p["ub2"] @ W_head + b_head                              # (1, 128)

    # ---- 0/1 head-segment matrices (exact in bf16) ------------------------------------
    seg = np.zeros((128, 128), np.float32)
    lanes = np.arange(3 * E)
    cols = (lanes // E) * H + (lanes % E) // dh
    seg[lanes, cols] = 1.0
    segT = np.zeros((128, 128), np.float32)
    segT[:3 * H, :3 * E] = seg[:3 * E, :3 * H].T

    # ---- pack: one narrow bf16 slab, one wide bf16 slab, one f32 bias slab ------------
    wpack = np.concatenate([W1, U1f, Wheadf, seg, segT], axis=0)     # (640, 128)
    w_off = {"W1": 0, "U1": 128, "Whead": 256, "seg": 384, "segT": 512}

    aux = np.zeros((8, 7 * 128), np.float32)
    aux[0, :] = bqkv[0]          # wide Q/K/V bias
    aux[1, :128] = b1[0]
    aux[2, :128] = bU1[0]
    aux[3, :128] = bheadf[0]

    meta = dict(metric_dim=metric_dim, Din=Din, w_off=w_off)
    return (jnp.asarray(wpack, jnp.bfloat16),
            jnp.asarray(wqkv, jnp.bfloat16),
            jnp.asarray(aux, jnp.float32),
            meta)


def make_forward(meta):
    kernel = functools.partial(_hier_kernel, meta=meta)
    vmem = pl.BlockSpec(memory_space=pltpu.MemorySpace.VMEM)

    @jax.jit
    def forward(text_emb, metrics, feedback, wpack, wqkv, aux):
        # lane-dense (B, 128) input; zero padding keeps the math exact
        x = jnp.concatenate([text_emb, metrics, feedback], axis=-1)
        x = jnp.pad(x, ((0, 0), (0, 128 - x.shape[1])))
        B = x.shape[0]
        heads = pl.pallas_call(
            kernel,
            out_shape=jax.ShapeDtypeStruct((B, 128), jnp.float32),
            in_specs=[vmem, vmem, vmem, vmem],
            out_specs=vmem,
        )(x, wpack, wqkv, aux)
        return heads[:, :1], heads[:, 1:1 + meta["metric_dim"]]

    return forward


# -----------------------------------------------------------------------------
# Parameter init (deterministic, synthetic) and a pure-JAX reference.
# -----------------------------------------------------------------------------
def init_params(key, text_dim, metric_dim, feedback_dim, hidden_dims):
    h0, h1, h2, h3 = hidden_dims
    keys = iter(jax.random.split(key, 64))

    def lin(in_d, out_d):
        w = jax.random.normal(next(keys), (in_d, out_d), jnp.float32) * 0.05
        b = jax.random.normal(next(keys), (1, out_d), jnp.float32) * 0.05
        return w, b

    p = {}
    p["tw1"], p["tb1"] = lin(text_dim, h0)
    p["tw2"], p["tb2"] = lin(h0, h1)
    p["mw1"], p["mb1"] = lin(metric_dim, h0)
    p["mw2"], p["mb2"] = lin(h0, h1)
    p["fw1"], p["fbb1"] = lin(feedback_dim, h0)
    p["fw2"], p["fbb2"] = lin(h0, h1)
    p["wq"], p["bq"] = lin(h1, h1)
    p["wk"], p["bk"] = lin(h1, h1)
    p["wv"], p["bv"] = lin(h1, h1)
    p["wo"], p["bo"] = lin(h1, h1)
    p["uw1"], p["ub1"] = lin(h1 * 3, h2)
    p["uw2"], p["ub2"] = lin(h2, h3)
    p["sw"], p["sb"] = lin(h3, 1)
    p["pw"], p["pb"] = lin(h3, metric_dim)
    return p


def reference_forward(text_emb, metrics, feedback, p, num_heads):
    def linear(x, w, b):
        return x @ w + b

    def enc(x, w1, b1, w2, b2):
        return linear(jnp.maximum(linear(x, w1, b1), 0.0), w2, b2)

    tf = enc(text_emb, p["tw1"], p["tb1"], p["tw2"], p["tb2"])
    mf = enc(metrics, p["mw1"], p["mb1"], p["mw2"], p["mb2"])
    ff = enc(feedback, p["fw1"], p["fbb1"], p["fw2"], p["fbb2"])
    feats = jnp.stack([tf, mf, ff], axis=0)              # (3, B, E)
    L, B, E = feats.shape
    H = num_heads
    d = E // H
    q = (feats @ p["wq"] + p["bq"]).reshape(L, B, H, d)
    k = (feats @ p["wk"] + p["bk"]).reshape(L, B, H, d)
    v = (feats @ p["wv"] + p["bv"]).reshape(L, B, H, d)
    scores = jnp.einsum("qbhd,kbhd->bhqk", q, k) / (d ** 0.5)
    probs = jax.nn.softmax(scores, axis=-1)
    out = jnp.einsum("bhqk,kbhd->qbhd", probs, v).reshape(L, B, E)
    attended = out @ p["wo"] + p["bo"]
    fused_in = jnp.concatenate([attended[0], attended[1], attended[2]], axis=-1)
    fused = jnp.maximum(fused_in @ p["uw1"] + p["ub1"], 0.0) @ p["uw2"] + p["ub2"]
    return fused @ p["sw"] + p["sb"], fused @ p["pw"] + p["pb"]


# -----------------------------------------------------------------------------
if __name__ == "__main__":
    B = 8
    text_dim, metric_dim, feedback_dim = 32, 16, 8
    hidden_dims = [32, 32, 64, 32]
    num_heads = 4

    key = jax.random.PRNGKey(0)
    kp, kt, km, kf = jax.random.split(key, 4)
    params = init_params(kp, text_dim, metric_dim, feedback_dim, hidden_dims)
    text_emb = jax.random.normal(kt, (B, text_dim), jnp.float32)
    metrics = jax.random.normal(km, (B, metric_dim), jnp.float32)
    feedback = jax.random.normal(kf, (B, feedback_dim), jnp.float32)

    wpack, wqkv, aux, meta = prepare_packed_params(
        params, text_dim, metric_dim, feedback_dim, hidden_dims, num_heads
    )
    forward = make_forward(meta)

    agent_scores, performance_pred = forward(text_emb, metrics, feedback, wpack, wqkv, aux)
    jax.block_until_ready((agent_scores, performance_pred))

    ref_agent, ref_perf = reference_forward(text_emb, metrics, feedback, params, num_heads)
    # weights run in bf16 on the MXU (f32 accumulation), so tolerances are bf16-level
    np.testing.assert_allclose(np.asarray(agent_scores), np.asarray(ref_agent),
                               rtol=5e-2, atol=5e-3)
    np.testing.assert_allclose(np.asarray(performance_pred), np.asarray(ref_perf),
                               rtol=5e-2, atol=5e-3)

    print("KERNEL_OK")
</pallas_src>

<mosaic_0001>
module attributes {stable_mosaic.version = 11 : i64} {
  func.func @_hier_kernel(%arg0: memref<8x128xf32, #tpu.memory_space<vmem>>, %arg1: memref<640x128xbf16, #tpu.memory_space<vmem>>, %arg2: memref<128x896xbf16, #tpu.memory_space<vmem>>, %arg3: memref<8x896xf32, #tpu.memory_space<vmem>>, %arg4: memref<8x128xf32, #tpu.memory_space<vmem>>) attributes {dimension_semantics = [], scalar_prefetch = 0 : i64, scratch_operands = 0 : i64, tpu.core_type = #tpu.core_type<tc>} {
    %c0 = arith.constant 0 : index
    %c0_0 = arith.constant 0 : index
    %0 = vector.load %arg0[%c0, %c0_0] : memref<8x128xf32, #tpu.memory_space<vmem>>, vector<8x128xf32>
    %1 = arith.truncf %0 : vector<8x128xf32> to vector<8x128xbf16>
    %c0_1 = arith.constant 0 : index
    %c0_2 = arith.constant 0 : index
    %2 = vector.load %arg1[%c0_1, %c0_2] : memref<640x128xbf16, #tpu.memory_space<vmem>>, vector<128x128xbf16>
    %cst = arith.constant dense<0.000000e+00> : vector<8x128xf32>
    %3 = tpu.matmul %1, %2, %cst {dimension_numbers = #tpu.dot_dimension_numbers<[1], [0], [0], [1], [0, 0, 1, 1], [], []>} : vector<8x128xbf16>, vector<128x128xbf16>, vector<8x128xf32> -> vector<8x128xf32>
    %c1 = arith.constant 1 : index
    %c0_3 = arith.constant 0 : index
    %4 = vector.load %arg3[%c1, %c0_3] : memref<8x896xf32, #tpu.memory_space<vmem>>, vector<1x128xf32>
    %5 = vector.broadcast %4 : vector<1x128xf32> to vector<8x128xf32>
    %6 = arith.addf %3, %5 : vector<8x128xf32>
    %cst_4 = arith.constant 0.000000e+00 : f32
    %7 = vector.broadcast %cst_4 : f32 to vector<8x128xf32>
    %8 = arith.maximumf %6, %7 : vector<8x128xf32>
    %9 = arith.truncf %8 : vector<8x128xf32> to vector<8x128xbf16>
    %c0_5 = arith.constant 0 : index
    %c0_6 = arith.constant 0 : index
    %10 = vector.load %arg2[%c0_5, %c0_6] : memref<128x896xbf16, #tpu.memory_space<vmem>>, vector<128x896xbf16>
    %cst_7 = arith.constant dense<0.000000e+00> : vector<8x896xf32>
    %11 = tpu.matmul %9, %10, %cst_7 {dimension_numbers = #tpu.dot_dimension_numbers<[1], [0], [0], [1], [0, 0, 1, 1], [], []>} : vector<8x128xbf16>, vector<128x896xbf16>, vector<8x896xf32> -> vector<8x896xf32>
    %c0_8 = arith.constant 0 : index
    %c0_9 = arith.constant 0 : index
    %12 = vector.load %arg3[%c0_8, %c0_9] : memref<8x896xf32, #tpu.memory_space<vmem>>, vector<1x896xf32>
    %13 = vector.broadcast %12 : vector<1x896xf32> to vector<8x896xf32>
    %14 = arith.addf %11, %13 : vector<8x896xf32>
    %15 = vector.extract_strided_slice %14 {offsets = [0, 0], sizes = [8, 128], strides = [1, 1]} : vector<8x896xf32> to vector<8x128xf32>
    %16 = vector.extract_strided_slice %14 {offsets = [0, 128], sizes = [8, 128], strides = [1, 1]} : vector<8x896xf32> to vector<8x128xf32>
    %17 = vector.extract_strided_slice %14 {offsets = [0, 256], sizes = [8, 128], strides = [1, 1]} : vector<8x896xf32> to vector<8x128xf32>
    %18 = vector.extract_strided_slice %14 {offsets = [0, 384], sizes = [8, 128], strides = [1, 1]} : vector<8x896xf32> to vector<8x128xf32>
    %19 = vector.extract_strided_slice %14 {offsets = [0, 512], sizes = [8, 128], strides = [1, 1]} : vector<8x896xf32> to vector<8x128xf32>
    %20 = vector.extract_strided_slice %14 {offsets = [0, 640], sizes = [8, 128], strides = [1, 1]} : vector<8x896xf32> to vector<8x128xf32>
    %21 = vector.extract_strided_slice %14 {offsets = [0, 768], sizes = [8, 128], strides = [1, 1]} : vector<8x896xf32> to vector<8x128xf32>
    %22 = arith.mulf %15, %16 : vector<8x128xf32>
    %23 = arith.mulf %15, %17 : vector<8x128xf32>
    %24 = arith.mulf %15, %18 : vector<8x128xf32>
    %25 = tpu.concatenate %22, %23, %24 in 0 : vector<8x128xf32>, vector<8x128xf32>, vector<8x128xf32> -> vector<24x128xf32>
    %26 = arith.truncf %25 : vector<24x128xf32> to vector<24x128xbf16>
    %c384 = arith.constant 384 : index
    %c0_10 = arith.constant 0 : index
    %27 = vector.load %arg1[%c384, %c0_10] : memref<640x128xbf16, #tpu.memory_space<vmem>>, vector<128x128xbf16>
    %cst_11 = arith.constant dense<0.000000e+00> : vector<24x128xf32>
    %28 = tpu.matmul %26, %27, %cst_11 {dimension_numbers = #tpu.dot_dimension_numbers<[1], [0], [0], [1], [0, 0, 1, 1], [], []>} : vector<24x128xbf16>, vector<128x128xbf16>, vector<24x128xf32> -> vector<24x128xf32>
    %29 = vector.extract_strided_slice %28 {offsets = [0, 0], sizes = [8, 128], strides = [1, 1]} : vector<24x128xf32> to vector<8x128xf32>
    %30 = vector.extract_strided_slice %28 {offsets = [8, 0], sizes = [8, 128], strides = [1, 1]} : vector<24x128xf32> to vector<8x128xf32>
    %31 = vector.extract_strided_slice %28 {offsets = [16, 0], sizes = [8, 128], strides = [1, 1]} : vector<24x128xf32> to vector<8x128xf32>
    %32 = arith.maximumf %29, %30 : vector<8x128xf32>
    %33 = arith.maximumf %32, %31 : vector<8x128xf32>
    %34 = arith.subf %29, %33 : vector<8x128xf32>
    %35 = math.exp %34 : vector<8x128xf32>
    %36 = arith.subf %30, %33 : vector<8x128xf32>
    %37 = math.exp %36 : vector<8x128xf32>
    %38 = arith.subf %31, %33 : vector<8x128xf32>
    %39 = math.exp %38 : vector<8x128xf32>
    %40 = arith.addf %35, %37 : vector<8x128xf32>
    %41 = arith.addf %40, %39 : vector<8x128xf32>
    %42 = tpu.reciprocal %41 {approx = true} : vector<8x128xf32> -> vector<8x128xf32>
    %43 = arith.mulf %35, %42 : vector<8x128xf32>
    %44 = arith.mulf %37, %42 : vector<8x128xf32>
    %45 = arith.mulf %39, %42 : vector<8x128xf32>
    %46 = tpu.concatenate %43, %44, %45 in 0 : vector<8x128xf32>, vector<8x128xf32>, vector<8x128xf32> -> vector<24x128xf32>
    %47 = arith.truncf %46 : vector<24x128xf32> to vector<24x128xbf16>
    %c512 = arith.constant 512 : index
    %c0_12 = arith.constant 0 : index
    %48 = vector.load %arg1[%c512, %c0_12] : memref<640x128xbf16, #tpu.memory_space<vmem>>, vector<128x128xbf16>
    %cst_13 = arith.constant dense<0.000000e+00> : vector<24x128xf32>
    %49 = tpu.matmul %47, %48, %cst_13 {dimension_numbers = #tpu.dot_dimension_numbers<[1], [0], [0], [1], [0, 0, 1, 1], [], []>} : vector<24x128xbf16>, vector<128x128xbf16>, vector<24x128xf32> -> vector<24x128xf32>
    %50 = vector.extract_strided_slice %49 {offsets = [0, 0], sizes = [8, 128], strides = [1, 1]} : vector<24x128xf32> to vector<8x128xf32>
    %51 = arith.mulf %50, %19 : vector<8x128xf32>
    %52 = vector.extract_strided_slice %49 {offsets = [8, 0], sizes = [8, 128], strides = [1, 1]} : vector<24x128xf32> to vector<8x128xf32>
    %53 = arith.mulf %52, %20 : vector<8x128xf32>
    %54 = arith.addf %51, %53 : vector<8x128xf32>
    %55 = vector.extract_strided_slice %49 {offsets = [16, 0], sizes = [8, 128], strides = [1, 1]} : vector<24x128xf32> to vector<8x128xf32>
    %56 = arith.mulf %55, %21 : vector<8x128xf32>
    %57 = arith.addf %54, %56 : vector<8x128xf32>
    %58 = arith.truncf %57 : vector<8x128xf32> to vector<8x128xbf16>
    %c128 = arith.constant 128 : index
    %c0_14 = arith.constant 0 : index
    %59 = vector.load %arg1[%c128, %c0_14] : memref<640x128xbf16, #tpu.memory_space<vmem>>, vector<128x128xbf16>
    %cst_15 = arith.constant dense<0.000000e+00> : vector<8x128xf32>
    %60 = tpu.matmul %58, %59, %cst_15 {dimension_numbers = #tpu.dot_dimension_numbers<[1], [0], [0], [1], [0, 0, 1, 1], [], []>} : vector<8x128xbf16>, vector<128x128xbf16>, vector<8x128xf32> -> vector<8x128xf32>
    %c2 = arith.constant 2 : index
    %c0_16 = arith.constant 0 : index
    %61 = vector.load %arg3[%c2, %c0_16] : memref<8x896xf32, #tpu.memory_space<vmem>>, vector<1x128xf32>
    %62 = vector.broadcast %61 : vector<1x128xf32> to vector<8x128xf32>
    %63 = arith.addf %60, %62 : vector<8x128xf32>
    %cst_17 = arith.constant 0.000000e+00 : f32
    %64 = vector.broadcast %cst_17 : f32 to vector<8x128xf32>
    %65 = arith.maximumf %63, %64 : vector<8x128xf32>
    %66 = arith.truncf %65 : vector<8x128xf32> to vector<8x128xbf16>
    %c256 = arith.constant 256 : index
    %c0_18 = arith.constant 0 : index
    %67 = vector.load %arg1[%c256, %c0_18] : memref<640x128xbf16, #tpu.memory_space<vmem>>, vector<128x128xbf16>
    %cst_19 = arith.constant dense<0.000000e+00> : vector<8x128xf32>
    %68 = tpu.matmul %66, %67, %cst_19 {dimension_numbers = #tpu.dot_dimension_numbers<[1], [0], [0], [1], [0, 0, 1, 1], [], []>} : vector<8x128xbf16>, vector<128x128xbf16>, vector<8x128xf32> -> vector<8x128xf32>
    %c3 = arith.constant 3 : index
    %c0_20 = arith.constant 0 : index
    %69 = vector.load %arg3[%c3, %c0_20] : memref<8x896xf32, #tpu.memory_space<vmem>>, vector<1x128xf32>
    %70 = vector.broadcast %69 : vector<1x128xf32> to vector<8x128xf32>
    %71 = arith.addf %68, %70 : vector<8x128xf32>
    %c0_21 = arith.constant 0 : index
    %c0_22 = arith.constant 0 : index
    %72 = vector.load %arg4[%c0_21, %c0_22] : memref<8x128xf32, #tpu.memory_space<vmem>>, vector<8x128xf32>
    tpu.vector_store %arg4[%c0_21, %c0_22], %71 {strides = array<i32>} : memref<8x128xf32, #tpu.memory_space<vmem>>, vector<8x128xf32>,
    return
  }
}

</mosaic_0001>

<bundles_post_ra>
// kernel: forward.1
= control target key start
LH: loop header
LB: loop body
LE: loop exit
PB: predicated region body
PF: predicated region fallthrough
CT: control target
= control target key end

     0   :  { %9 = vsyncpa [#allocation3], 0  ;;  %s1817_s0 = inlined_call_operand.vmem [shape: f32[8,128], index: 0, kind: input, shape index: {}]   ;;  %s1818_s1 = inlined_call_operand.hbm [shape: bf16[640,128], index: 1, kind: input, shape index: {}]   ;;  %s1819_s2 = inlined_call_operand.hbm [shape: bf16[128,896], index: 2, kind: input, shape index: {}]   ;;  %s1820_s3 = inlined_call_operand.hbm [shape: f32[8,896], index: 3, kind: input, shape index: {}]   ;;  %s1821_s4 = inlined_call_operand.vmem [shape: f32[8,128], index: 4, kind: output, shape index: {}]  }
   0x1   :  { %10 = vsyncpa [#allocation5], 0  ;;  %s1673_s15 = smov [#allocation4]   ;;  %s1603_s19 = scalar_lea.hbm %s1819_s2, 7168 }
   0x2   :  { %s30_s16 = sshll.u32 %s1673_s15, 4  ;;  %p1604_p0 = scmp.ne.s32.totalorder %s1819_s2, %s1603_s19  ;;  %s31_s16 = int_to_ptr.vmem [resolvable:$true] %s30_s16 }
   0x3   :  { %p1607_p1 = scmp.lt.u32.totalorder %s1603_s19, %s1819_s2 }
   0x5   :  { %p1609_p2 = pnand %p1607_p1, %p1604_p0 }
   0x7   :  { %1612 = shalt.err (!%p1609_p2)
}
   0x8   :  { %s1613_s24 = scalar_lea.vmem %s31_s16, 7168  ;;  %p1618_p4 = scmp.lt.s32.totalorder %s31_s16, %s31_s16 }
   0x9   :  { %p1614_p3 = scmp.ne.s32.totalorder %s31_s16, %s1613_s24  ;;  %p1619_p5 = scmp.lt.s32.totalorder %s1613_s24, %s1613_s24 }
   0xb   :  { %p1620_p6 = por %p1619_p5, %p1618_p4 }
   0xd   :  { %p1621_p7 = pnand %p1620_p6, %p1614_p3 }
   0xf   :  { %1624 = shalt.err (!%p1621_p7)
}
  0x10   :  { %s1674_s25 = smov 448   ;;  %s1675_s26 = smov 28  }
  0x11   :  { %36 = dma.hbm_to_vmem [thread:$0]  %s1819_s2, 7168, %s31_s16, [#allocation5], %s1674_s25, %s1674_s25, %s1675_s26  }
  0x12   :  { %s1676_s29 = smov [#allocation2]   ;;  %s1625_s7 = scalar_lea.hbm %s1818_s1, 5120 }
  0x13   :  { %s18_s30 = sshll.u32 %s1676_s29, 4  ;;  %p1626_p8 = scmp.ne.s32.totalorder %s1818_s1, %s1625_s7  ;;  %s19_s30 = int_to_ptr.vmem [resolvable:$true] %s18_s30 }
  0x14   :  { %p1629_p9 = scmp.lt.u32.totalorder %s1625_s7, %s1818_s1 }
  0x16   :  { %p1631_p10 = pnand %p1629_p9, %p1626_p8 }
  0x18   :  { %1634 = shalt.err (!%p1631_p10)
}
  0x19   :  { %s1635_s12 = scalar_lea.vmem %s19_s30, 5120  ;;  %p1640_p12 = scmp.lt.s32.totalorder %s19_s30, %s19_s30 }
  0x1a   :  { %p1636_p11 = scmp.ne.s32.totalorder %s19_s30, %s1635_s12  ;;  %p1641_p13 = scmp.lt.s32.totalorder %s1635_s12, %s1635_s12 }
  0x1c   :  { %p1642_p0 = por %p1641_p13, %p1640_p12 }
  0x1e   :  { %p1643_p1 = pnand %p1642_p0, %p1636_p11 }
  0x20   :  { %1646 = shalt.err (!%p1643_p1)
}
  0x21   :  { %s1677_s2 = smov 64   ;;  %s1678_s13 = smov 4  }
  0x22   :  { %24 = dma.hbm_to_vmem [thread:$0]  %s1818_s1, 5120, %s19_s30, [#allocation3], %s1677_s2, %s1677_s2, %s1678_s13  }
  0x23   :  { %s1679_s16 = smov [#allocation6]   ;;  %s1647_s20 = scalar_lea.hbm %s1820_s3, 896 }
  0x24   :  { %s43_s17 = sshll.u32 %s1679_s16, 4  ;;  %p1648_p2 = scmp.ne.s32.totalorder %s1820_s3, %s1647_s20  ;;  %s44_s17 = int_to_ptr.vmem [resolvable:$true] %s43_s17 }
  0x25   :  { %p1651_p3 = scmp.lt.u32.totalorder %s1647_s20, %s1820_s3 }
  0x27   :  { %p1653_p4 = pnand %p1651_p3, %p1648_p2 }
  0x29   :  { %1656 = shalt.err (!%p1653_p4)
}
  0x2a   :  { %s1657_s25 = scalar_lea.vmem %s44_s17, 896  ;;  %p1662_p6 = scmp.lt.s32.totalorder %s44_s17, %s44_s17 }
  0x2b   :  { %p1658_p5 = scmp.ne.s32.totalorder %s44_s17, %s1657_s25  ;;  %p1663_p7 = scmp.lt.s32.totalorder %s1657_s25, %s1657_s25 }
  0x2d   :  { %p1664_p8 = por %p1663_p7, %p1662_p6 }
  0x2f   :  { %p1665_p9 = pnand %p1664_p8, %p1658_p5 }
  0x31   :  { %1668 = shalt.err (!%p1665_p9)
}
  0x32   :  { %46 = dma.hbm_to_vmem [thread:$0]  %s1820_s3, 896, %s44_s17, [#allocation5]  }
  0x33   :  { %1669 = dma.done.wait [#allocation3], 5120  }
  0x34   :  { %1670 = vsyncadd [#allocation3], 4294962176 }
  0x35   :  { %1671 = dma.done.wait [#allocation5], 8064  }
  0x36   :  { %1672 = vsyncadd [#allocation5], 4294959232  ;;  %v1680_v0 = vmov 0.0   ;;  %vm1681_vm0 = vmmov 0   ;;  %v1475_v1 = vld [vmem:[#allocation2] sm:$0xff]   ;;  %v1476_v2 = vld [vmem:[#allocation2 + $0x8] sm:$0xff]  }
  0x37   :  { %1345 = vmatprep.subr.bf16.mxu0 %v1680_v0  ;;  %1361 = vmatprep.mubr.msk.bf16.mxu0 %vm1681_vm0, %v1680_v0  ;;  %v1477_v3 = vld [vmem:[#allocation2 + $0x10] sm:$0xff]   ;;  %v1483_v4 = vld [vmem:[#allocation4 + $0x4] ss:$28 sps:$4 sm:$0xff]   ;;  %v1478_v5 = vld [vmem:[#allocation2 + $0x18] sm:$0xff]   ;;  %v1682_v44 = vmov 0  }
  0x38   :  { %1346 = vmatpush3.bf16.msra.mxu0 %v1475_v1  ;;  %v1488_v6 = vld [vmem:[#allocation4] ss:$28 sps:$4 sm:$0xff]   ;;  %557 = vmatprep.subr.bf16.mxu1 %v1483_v4  ;;  %v1494_v9 = vld [vmem:[#allocation4 + $0x38] ss:$28 sps:$4 sm:$0xff]   ;;  %v1500_v11 = vld [vmem:[#allocation4 + $0x70] ss:$28 sps:$4 sm:$0xff]  }
  0x39   :  { %1347 = vmatprep.subr.bf16.mxu0 %v1680_v0  ;;  %v1489_v7 = vld [vmem:[#allocation4 + $0x3c] ss:$28 sps:$4 sm:$0xff]   ;;  %558 = vmatpush1.bf16.msra.mxu1 %v1488_v6  ;;  %v1479_v8 = vld [vmem:[#allocation2 + $0x20] sm:$0xff]   ;;  %v1495_v10 = vld [vmem:[#allocation4 + $0x74] ss:$28 sps:$4 sm:$0xff]  }
  0x3a   :  { %559 = vmatprep.subr.bf16.mxu1 %v1489_v7  ;;  %v1501_v12 = vld [vmem:[#allocation4 + $0xac] ss:$28 sps:$4 sm:$0xff]   ;;  %v1507_v15 = vld [vmem:[#allocation4 + $0xe4] ss:$28 sps:$4 sm:$0xff]   ;;  %v1481_v16 = vld [vmem:[#allocation2 + $0x30] sm:$0xff]   ;;  %589 = vmatprep.mubr.bf16.mxu1 %v1682_v44 }
  0x3b   :  { %v1480_v13 = vld [vmem:[#allocation2 + $0x28] sm:$0xff]   ;;  %v1482_v17 = vld [vmem:[#allocation2 + $0x38] sm:$0xff]   ;;  %v57_v20 = vld [vmem:[%s1817_s0] sm:$0xff] }
  0x3c   :  { %1348 = vmatpush3.bf16.msra.mxu0 %v1476_v2  ;;  %v1506_v14 = vld [vmem:[#allocation4 + $0xa8] ss:$28 sps:$4 sm:$0xff]   ;;  %v1512_v18 = vld [vmem:[#allocation4 + $0xe0] ss:$28 sps:$4 sm:$0xff]   ;;  %v1518_v22 = vld [vmem:[#allocation4 + $0x118] ss:$28 sps:$4 sm:$0xff]   ;;  %v58_v25 = vpack.c.bf16 %v57_v20, %v57_v20 }
  0x3d   :  { %1349 = vmatprep.subr.bf16.mxu0 %v1680_v0  ;;  %560 = vmatpush1.bf16.msra.mxu1 %v1494_v9  ;;  %v1513_v19 = vld [vmem:[#allocation4 + $0x11c] ss:$28 sps:$4 sm:$0xff]   ;;  %v1487_v21 = vld [vmem:[#allocation4 + $0xc] ss:$28 sps:$4 sm:$0xff]   ;;  %v1519_v23 = vld [vmem:[#allocation4 + $0x154] ss:$28 sps:$4 sm:$0xff]  }
  0x3e   :  { %561 = vmatprep.subr.bf16.mxu1 %v1495_v10  ;;  %v1485_v24 = vld [vmem:[#allocation4 + $0x8] ss:$28 sps:$4 sm:$0xff]   ;;  %v1524_v27 = vld [vmem:[#allocation4 + $0x150] ss:$28 sps:$4 sm:$0xff]   ;;  %v1491_v28 = vld [vmem:[#allocation4 + $0x40] ss:$28 sps:$4 sm:$0xff]  }
  0x3f   :  { %v1493_v26 = vld [vmem:[#allocation4 + $0x44] ss:$28 sps:$4 sm:$0xff]   ;;  %v1499_v29 = vld [vmem:[#allocation4 + $0x7c] ss:$28 sps:$4 sm:$0xff]   ;;  %v1505_v31 = vld [vmem:[#allocation4 + $0xb4] ss:$28 sps:$4 sm:$0xff]  }
  0x40   :  { %1350 = vmatpush3.bf16.msra.mxu0 %v1477_v3  ;;  %v1497_v30 = vld [vmem:[#allocation4 + $0x78] ss:$28 sps:$4 sm:$0xff]   ;;  %v1503_v32 = vld [vmem:[#allocation4 + $0xb0] ss:$28 sps:$4 sm:$0xff]   ;;  %v1509_v34 = vld [vmem:[#allocation4 + $0xe8] ss:$28 sps:$4 sm:$0xff]  }
  0x41   :  { %1351 = vmatprep.subr.bf16.mxu0 %v1680_v0  ;;  %562 = vmatpush1.bf16.msra.mxu1 %v1500_v11  ;;  %v1511_v33 = vld [vmem:[#allocation4 + $0xec] ss:$28 sps:$4 sm:$0xff]   ;;  %v1517_v35 = vld [vmem:[#allocation4 + $0x124] ss:$28 sps:$4 sm:$0xff]   ;;  %v1523_v37 = vld [vmem:[#allocation4 + $0x15c] ss:$28 sps:$4 sm:$0xff]  }
  0x42   :  { %563 = vmatprep.subr.bf16.mxu1 %v1501_v12  ;;  %v1515_v36 = vld [vmem:[#allocation4 + $0x120] ss:$28 sps:$4 sm:$0xff]   ;;  %v1521_v38 = vld [vmem:[#allocation4 + $0x158] ss:$28 sps:$4 sm:$0xff]   ;;  %v1525_v39 = vld [vmem:[#allocation4 + $0x18c] ss:$28 sps:$4 sm:$0xff]  }
  0x43   :  { %v1529_v40 = vld [vmem:[#allocation4 + $0x194] ss:$28 sps:$4 sm:$0xff]   ;;  %v1530_v42 = vld [vmem:[#allocation4 + $0x188] ss:$28 sps:$4 sm:$0xff]   ;;  %v75_v45 = vld [vmem:[#allocation6 + $0x1] ss:$0 sm:$0xff] }
  0x44   :  { %1352 = vmatpush3.bf16.msra.mxu0 %v1478_v5  ;;  %v1527_v41 = vld [vmem:[#allocation4 + $0x190] ss:$28 sps:$4 sm:$0xff]   ;;  %v1534_v53 = vld [vmem:[#allocation4 + $0x18] ss:$28 sps:$4 sm:$0xff]   ;;  %v1535_v56 = vld [vmem:[#allocation4 + $0x48] ss:$28 sps:$4 sm:$0xff]  }
  0x45   :  { %1353 = vmatprep.subr.bf16.mxu0 %v1680_v0  ;;  %564 = vmatpush1.bf16.msra.mxu1 %v1506_v14  ;;  %v1533_v43 = vld [vmem:[#allocation4 + $0x14] ss:$28 sps:$4 sm:$0xff]   ;;  %v1537_v55 = vld [vmem:[#allocation4 + $0x4c] ss:$28 sps:$4 sm:$0xff]   ;;  %v1541_v58 = vld [vmem:[#allocation4 + $0x84] ss:$28 sps:$4 sm:$0xff]  }
  0x46   :  { %565 = vmatprep.subr.bf16.mxu1 %v1507_v15  ;;  %v1531_v52 = vld [vmem:[#allocation4 + $0x10] ss:$28 sps:$4 sm:$0xff]   ;;  %v1539_v59 = vld [vmem:[#allocation4 + $0x80] ss:$28 sps:$4 sm:$0xff]   ;;  %v1542_v60 = vld [vmem:[#allocation4 + $0x88] ss:$28 sps:$4 sm:$0xff]  }
  0x47   :  { %v1538_v57 = vld [vmem:[#allocation4 + $0x50] ss:$28 sps:$4 sm:$0xff]   ;;  %v1545_v61 = vld [vmem:[#allocation4 + $0xbc] ss:$28 sps:$4 sm:$0xff]   ;;  %v1551_v5 = vld [vmem:[#allocation4 + $0x128] ss:$28 sps:$4 sm:$0xff]  }
  0x48   :  { %1354 = vmatpush3.bf16.msra.mxu0 %v1479_v8  ;;  %v1543_v62 = vld [vmem:[#allocation4 + $0xb8] ss:$28 sps:$4 sm:$0xff]   ;;  %v1546_v63 = vld [vmem:[#allocation4 + $0xc0] ss:$28 sps:$4 sm:$0xff]   ;;  %v1547_v2 = vld [vmem:[#allocation4 + $0xf0] ss:$28 sps:$4 sm:$0xff]  }
  0x49   :  { %1355 = vmatprep.subr.bf16.mxu0 %v1680_v0  ;;  %566 = vmatpush1.bf16.msra.mxu1 %v1512_v18  ;;  %v1549_v1 = vld [vmem:[#allocation4 + $0xf4] ss:$28 sps:$4 sm:$0xff]   ;;  %v1553_v4 = vld [vmem:[#allocation4 + $0x12c] ss:$28 sps:$4 sm:$0xff]   ;;  %v1557_v7 = vld [vmem:[#allocation4 + $0x164] ss:$28 sps:$4 sm:$0xff]  }
  0x4a   :  { %567 = vmatprep.subr.bf16.mxu1 %v1513_v19  ;;  %v1550_v3 = vld [vmem:[#allocation4 + $0xf8] ss:$28 sps:$4 sm:$0xff]   ;;  %v1554_v6 = vld [vmem:[#allocation4 + $0x130] ss:$28 sps:$4 sm:$0xff]   ;;  %v1555_v8 = vld [vmem:[#allocation4 + $0x160] ss:$28 sps:$4 sm:$0xff]  }
  0x4b   :  { %v1558_v9 = vld [vmem:[#allocation4 + $0x168] ss:$28 sps:$4 sm:$0xff]   ;;  %v1561_v10 = vld [vmem:[#allocation4 + $0x19c] ss:$28 sps:$4 sm:$0xff]   ;;  %v1565_v15 = vld [vmem:[#allocation2 + $0xd0] sm:$0xff]  }
  0x4c   :  { %1356 = vmatpush3.bf16.msra.mxu0 %v1480_v13  ;;  %v1559_v11 = vld [vmem:[#allocation4 + $0x198] ss:$28 sps:$4 sm:$0xff]   ;;  %v1562_v12 = vld [vmem:[#allocation4 + $0x1a0] ss:$28 sps:$4 sm:$0xff]   ;;  %v1564_v14 = vld [vmem:[#allocation2 + $0xc8] sm:$0xff]  }
  0x4d   :  { %1357 = vmatprep.subr.bf16.mxu0 %v1680_v0  ;;  %568 = vmatpush1.bf16.msra.mxu1 %v1518_v22  ;;  %v1563_v13 = vld [vmem:[#allocation2 + $0xc0] sm:$0xff]   ;;  %v1568_v18 = vld [vmem:[#allocation2 + $0xe8] sm:$0xff]   ;;  %v1569_v19 = vld [vmem:[#allocation2 + $0xf0] sm:$0xff]  }
  0x4e   :  { %569 = vmatprep.subr.bf16.mxu1 %v1519_v23  ;;  %v1570_v20 = vld [vmem:[#allocation2 + $0xf8] sm:$0xff]  }
  0x4f   :  { %v230_v23 = vld [vmem:[#allocation6] ss:$8 sm:$0xf] }
  0x50   :  { %1358 = vmatpush3.bf16.msra.mxu0 %v1481_v16  ;;  %v1566_v16 = vld [vmem:[#allocation2 + $0xd8] sm:$0xff]  }
  0x51   :  { %1359 = vmatprep.subr.bf16.mxu0 %v1680_v0  ;;  %570 = vmatpush1.bf16.msra.mxu1 %v1524_v27 }
  0x52   :  { %571 = vmatprep.subr.bf16.mxu1 %v1525_v39 }
  0x54   :  { %1360 = vmatpush3.bf16.msra.mxu0 %v1482_v17  ;;  %v1567_v17 = vld [vmem:[#allocation2 + $0xe0] sm:$0xff]  }
  0x55   :  { %598 = vmatprep.subr.bf16.mxu0 %v1487_v21  ;;  %572 = vmatpush1.bf16.msra.mxu1 %v1530_v42  ;;  %v234_v21 = vlaneseq }
  0x56   :  { %639 = vmatprep.subr.bf16.mxu1 %v1533_v43 }
  0x57   :  { %1362 = vmatmul.mubr.bf16.vlgmr.msra.gmra.mrb[0].mxu0 %v58_v25  ;;  %v1768_v22 = vshrl.u32 %v234_v21, 7 }
  0x58   :  { %599 = vmatpush1.bf16.msra.mxu0 %v1485_v24  ;;  %630 = vmatprep.mubr.bf16.mxu0 %v1682_v44  ;;  %v231_v24 = vld [vmem:[#allocation6] ss:$8 sm:$0xf0] }
  0x59   :  { %600 = vmatprep.subr.bf16.mxu0 %v1493_v26  ;;  %v1770_v25 = vor.u32 %v231_v24, %v230_v23  ;;  %v236_v26 = vsub.s32 0, %v1768_v22  ;;  %v244_v27 = vsub.s32 2, %v1768_v22 }
  0x5c   :  { %601 = vmatpush1.bf16.msra.mxu0 %v1491_v28  ;;  %v240_v28 = vsub.s32 1, %v1768_v22 }
  0x5d   :  { %602 = vmatprep.subr.bf16.mxu0 %v1499_v29  ;;  %v248_v29 = vsub.s32 3, %v1768_v22 }
  0x60   :  { %603 = vmatpush1.bf16.msra.mxu0 %v1497_v30  ;;  %v237_v30 = vrot.slane %v1770_v25, %v236_v26 }
  0x61   :  { %604 = vmatprep.subr.bf16.mxu0 %v1505_v31  ;;  %v245_v31 = vrot.slane %v1770_v25, %v244_v27 }
  0x64   :  { %605 = vmatpush1.bf16.msra.mxu0 %v1503_v32  ;;  %v241_v32 = vrot.slane %v1770_v25, %v240_v28 }
  0x65   :  { %606 = vmatprep.subr.bf16.mxu0 %v1511_v33  ;;  %v249_v33 = vrot.slane %v1770_v25, %v248_v29 }
  0x68   :  { %607 = vmatpush1.bf16.msra.mxu0 %v1509_v34 }
  0x69   :  { %608 = vmatprep.subr.bf16.mxu0 %v1517_v35 }
  0x6c   :  { %609 = vmatpush1.bf16.msra.mxu0 %v1515_v36 }
  0x6d   :  { %610 = vmatprep.subr.bf16.mxu0 %v1523_v37 }
  0x70   :  { %611 = vmatpush1.bf16.msra.mxu0 %v1521_v38 }
  0x71   :  { %612 = vmatprep.subr.bf16.mxu0 %v1529_v40 }
  0x74   :  { %613 = vmatpush1.bf16.msra.mxu0 %v1527_v41 }
  0x75   :  { %1365 = vmatprep.subr.bf16.mxu0 %v1680_v0 }
 0x12a   :  { %v158_v46 = vpop.f32.mrb[0].mxu0 }
 0x12b   :  { %v159_v47 = vadd.f32 %v158_v46, %v75_v45  ;;  %v1363_v48 = vpop.f32.mrb[1].mxu0 }
 0x12c   :  { %v161_v49 = vpop.f32.mrb[2].mxu0 }
 0x12d   :  { %v164_v50 = vmax.f32 %v159_v47, 0.0  ;;  %v1364_v51 = vpop.f32.mrb[3].mxu0 }
 0x12f   :  { %v165_v54 = vpack.c.bf16 %v164_v50, %v164_v50 }
 0x131   :  { %590 = vmatmul.mubr.bf16.vlgmr.msra.gmra.mrb[0].mxu1 %v165_v54  ;;  %631 = vmatmul.mubr.bf16.vlgmr.msra.gmra.mrb[4].mxu0 %v165_v54 }
 0x132   :  { %640 = vmatpush1.bf16.msra.mxu1 %v1531_v52  ;;  %1366 = vmatpush3.bf16.msra.mxu0 %v1534_v53 }
 0x133   :  { %641 = vmatprep.subr.bf16.mxu1 %v1537_v55  ;;  %1367 = vmatprep.subr.bf16.mxu0 %v1680_v0 }
 0x134   :  { %671 = vmatprep.mubr.bf16.mxu1 %v1682_v44  ;;  %1381 = vmatprep.mubr.msk.bf16.mxu0 %vm1681_vm0, %v1680_v0 }
 0x136   :  { %642 = vmatpush1.bf16.msra.mxu1 %v1535_v56  ;;  %1368 = vmatpush3.bf16.msra.mxu0 %v1538_v57 }
 0x137   :  { %643 = vmatprep.subr.bf16.mxu1 %v1541_v58  ;;  %1369 = vmatprep.subr.bf16.mxu0 %v1680_v0 }
 0x13a   :  { %644 = vmatpush1.bf16.msra.mxu1 %v1539_v59  ;;  %1370 = vmatpush3.bf16.msra.mxu0 %v1542_v60  ;;  %v1571_v59 = vld [vmem:[#allocation2 + $0x100] sm:$0xff]   ;;  %v1572_v60 = vld [vmem:[#allocation2 + $0x108] sm:$0xff]  }
 0x13b   :  { %645 = vmatprep.subr.bf16.mxu1 %v1545_v61  ;;  %1371 = vmatprep.subr.bf16.mxu0 %v1680_v0  ;;  %v1573_v61 = vld [vmem:[#allocation2 + $0x110] sm:$0xff]  }
 0x13e   :  { %646 = vmatpush1.bf16.msra.mxu1 %v1543_v62  ;;  %1372 = vmatpush3.bf16.msra.mxu0 %v1546_v63  ;;  %v1574_v62 = vld [vmem:[#allocation2 + $0x118] sm:$0xff]   ;;  %v1575_v63 = vld [vmem:[#allocation2 + $0x120] sm:$0xff]  }
 0x13f   :  { %647 = vmatprep.subr.bf16.mxu1 %v1549_v1  ;;  %1373 = vmatprep.subr.bf16.mxu0 %v1680_v0  ;;  %v1576_v1 = vld [vmem:[#allocation2 + $0x128] sm:$0xff]  }
 0x142   :  { %648 = vmatpush1.bf16.msra.mxu1 %v1547_v2  ;;  %1374 = vmatpush3.bf16.msra.mxu0 %v1550_v3  ;;  %v1577_v2 = vld [vmem:[#allocation2 + $0x130] sm:$0xff]   ;;  %v1578_v3 = vld [vmem:[#allocation2 + $0x138] sm:$0xff]  }
 0x143   :  { %649 = vmatprep.subr.bf16.mxu1 %v1553_v4  ;;  %1375 = vmatprep.subr.bf16.mxu0 %v1680_v0  ;;  %v1579_v4 = vld [vmem:[#allocation2 + $0x40] sm:$0xff]  }
 0x146   :  { %650 = vmatpush1.bf16.msra.mxu1 %v1551_v5  ;;  %1376 = vmatpush3.bf16.msra.mxu0 %v1554_v6  ;;  %v1580_v5 = vld [vmem:[#allocation2 + $0x48] sm:$0xff]   ;;  %v1581_v6 = vld [vmem:[#allocation2 + $0x50] sm:$0xff]  }
 0x147   :  { %651 = vmatprep.subr.bf16.mxu1 %v1557_v7  ;;  %1377 = vmatprep.subr.bf16.mxu0 %v1680_v0  ;;  %v1582_v7 = vld [vmem:[#allocation2 + $0x58] sm:$0xff]  }
 0x14a   :  { %652 = vmatpush1.bf16.msra.mxu1 %v1555_v8  ;;  %1378 = vmatpush3.bf16.msra.mxu0 %v1558_v9  ;;  %v1583_v8 = vld [vmem:[#allocation2 + $0x60] sm:$0xff]  }
 0x14b   :  { %653 = vmatprep.subr.bf16.mxu1 %v1561_v10  ;;  %1379 = vmatprep.subr.bf16.mxu0 %v1680_v0 }
 0x14e   :  { %654 = vmatpush1.bf16.msra.mxu1 %v1559_v11  ;;  %1380 = vmatpush3.bf16.msra.mxu0 %v1562_v12 }
 0x14f   :  { %1385 = vmatprep.subr.bf16.mxu1 %v1563_v13  ;;  %1405 = vmatprep.subr.bf16.mxu0 %v1571_v59 }
 0x151   :  { %672 = vmatmul.mubr.bf16.vlgmr.msra.gmra.mrb[4].mxu1 %v165_v54  ;;  %1382 = vmatmul.mubr.bf16.vlgmr.msra.gmra.mrb[8].mxu0 %v165_v54 }
 0x152   :  { %1386 = vmatpush3.bf16.msra.mxu1 %v1563_v13  ;;  %1406 = vmatpush3.bf16.msra.mxu0 %v1571_v59 }
 0x153   :  { %1387 = vmatprep.subr.bf16.mxu1 %v1564_v14  ;;  %1407 = vmatprep.subr.bf16.mxu0 %v1572_v60 }
 0x156   :  { %1388 = vmatpush3.bf16.msra.mxu1 %v1564_v14  ;;  %1408 = vmatpush3.bf16.msra.mxu0 %v1572_v60 }
 0x157   :  { %1389 = vmatprep.subr.bf16.mxu1 %v1565_v15  ;;  %1409 = vmatprep.subr.bf16.mxu0 %v1573_v61 }
 0x15a   :  { %1390 = vmatpush3.bf16.msra.mxu1 %v1565_v15  ;;  %1410 = vmatpush3.bf16.msra.mxu0 %v1573_v61 }
 0x15b   :  { %1391 = vmatprep.subr.bf16.mxu1 %v1566_v16  ;;  %1411 = vmatprep.subr.bf16.mxu0 %v1574_v62 }
 0x15e   :  { %1392 = vmatpush3.bf16.msra.mxu1 %v1566_v16  ;;  %1412 = vmatpush3.bf16.msra.mxu0 %v1574_v62 }
 0x15f   :  { %1393 = vmatprep.subr.bf16.mxu1 %v1567_v17  ;;  %1413 = vmatprep.subr.bf16.mxu0 %v1575_v63 }
 0x162   :  { %1394 = vmatpush3.bf16.msra.mxu1 %v1567_v17  ;;  %1414 = vmatpush3.bf16.msra.mxu0 %v1575_v63 }
 0x163   :  { %1395 = vmatprep.subr.bf16.mxu1 %v1568_v18  ;;  %1415 = vmatprep.subr.bf16.mxu0 %v1576_v1 }
 0x166   :  { %1396 = vmatpush3.bf16.msra.mxu1 %v1568_v18  ;;  %1416 = vmatpush3.bf16.msra.mxu0 %v1576_v1  ;;  %v1593_v1 = vld [vmem:[#allocation2 + $0xb0] sm:$0xff]  }
 0x167   :  { %1397 = vmatprep.subr.bf16.mxu1 %v1569_v19  ;;  %1417 = vmatprep.subr.bf16.mxu0 %v1577_v2 }
 0x16a   :  { %1398 = vmatpush3.bf16.msra.mxu1 %v1569_v19  ;;  %1418 = vmatpush3.bf16.msra.mxu0 %v1577_v2 }
 0x16b   :  { %1399 = vmatprep.subr.bf16.mxu1 %v1570_v20  ;;  %1419 = vmatprep.subr.bf16.mxu0 %v1578_v3 }
 0x16e   :  { %1400 = vmatpush3.bf16.msra.mxu1 %v1570_v20  ;;  %1420 = vmatpush3.bf16.msra.mxu0 %v1578_v3 }
 0x16f   :  { %1425 = vmatprep.subr.bf16.mxu1 %v1680_v0  ;;  %1445 = vmatprep.subr.bf16.mxu0 %v1680_v0 }
 0x204   :  { %v591_v34 = vpop.f32.mrb[0].mxu1  ;;  %v632_v35 = vpop.f32.mrb[4].mxu0 }
 0x205   :  { %v592_v36 = vadd.f32 %v591_v34, %v237_v30  ;;  %v633_v37 = vadd.f32 %v632_v35, %v245_v31  ;;  %v593_v38 = vpop.f32.mrb[1].mxu1  ;;  %v634_v39 = vpop.f32.mrb[5].mxu0  ;;  %v1584_v34 = vld [vmem:[#allocation2 + $0x68] sm:$0xff]   ;;  %v1585_v35 = vld [vmem:[#allocation2 + $0x70] sm:$0xff]  }
 0x206   :  { %v594_v40 = vadd.f32 %v593_v38, %v241_v32  ;;  %v635_v41 = vadd.f32 %v634_v39, %v249_v33  ;;  %v595_v42 = vpop.f32.mrb[2].mxu1  ;;  %v636_v43 = vpop.f32.mrb[6].mxu0  ;;  %v1588_v38 = vld [vmem:[#allocation2 + $0x88] sm:$0xff]   ;;  %v1589_v39 = vld [vmem:[#allocation2 + $0x90] sm:$0xff]  }
 0x207   :  { %v721_v44 = vmul.f32 %v633_v37, %v592_v36  ;;  %v596_v45 = vpop.f32.mrb[3].mxu1  ;;  %v637_v46 = vpop.f32.mrb[7].mxu0  ;;  %v1587_v37 = vld [vmem:[#allocation2 + $0x80] sm:$0xff]   ;;  %v1592_v42 = vld [vmem:[#allocation2 + $0xa8] sm:$0xff]   ;;  %v260_v43 = vsub.s32 6, %v1768_v22 }
 0x208   :  { %v720_v47 = vmul.f32 %v594_v40, %v592_v36  ;;  %v722_v48 = vmul.f32 %v635_v41, %v592_v36  ;;  %v1586_v36 = vld [vmem:[#allocation2 + $0x78] sm:$0xff]   ;;  %v1591_v41 = vld [vmem:[#allocation2 + $0xa0] sm:$0xff]   ;;  %v256_v45 = vsub.s32 5, %v1768_v22 }
 0x209   :  { %v1590_v40 = vld [vmem:[#allocation2 + $0x98] sm:$0xff]   ;;  %v261_v46 = vrot.slane %v1770_v25, %v260_v43 }
 0x20a   :  { %v724_v49 = vpack.c.bf16 %v722_v48, %v722_v48  ;;  %v723_v50 = vpack.c.bf16 %v721_v44, %v720_v47  ;;  %v252_v44 = vsub.s32 4, %v1768_v22  ;;  %v257_v48 = vrot.slane %v1770_v25, %v256_v45 }
 0x20c   :  { %1401 = vmatprep.mubr.bf16.mxu1 %v723_v50  ;;  %v253_v47 = vrot.slane %v1770_v25, %v252_v44  ;;  %v1594_v25 = vld [vmem:[#allocation2 + $0xb8] sm:$0xff]  }
 0x20d   :  { %1402 = vmatmul.mubr.bf16.vlgmr.msra.gmra.mrb[8].mxu1 %v724_v49 }
 0x20e   :  { %1441 = vmatprep.mubr.msk.bf16.mxu1 %vm1681_vm0, %v1680_v0  ;;  %1426 = vmatpush3.bf16.msra.mxu1 %v1579_v4 }
 0x20f   :  { %1427 = vmatprep.subr.bf16.mxu1 %v1680_v0 }
 0x212   :  { %1428 = vmatpush3.bf16.msra.mxu1 %v1580_v5 }
 0x213   :  { %1429 = vmatprep.subr.bf16.mxu1 %v1680_v0 }
 0x216   :  { %1430 = vmatpush3.bf16.msra.mxu1 %v1581_v6 }
 0x217   :  { %1431 = vmatprep.subr.bf16.mxu1 %v1680_v0 }
 0x21a   :  { %1432 = vmatpush3.bf16.msra.mxu1 %v1582_v7  ;;  %v1097_v7 = vld [vmem:[#allocation6 + $0x3] ss:$0 sm:$0xff] }
 0x21b   :  { %1433 = vmatprep.subr.bf16.mxu1 %v1680_v0 }
 0x21e   :  { %1434 = vmatpush3.bf16.msra.mxu1 %v1583_v8 }
 0x21f   :  { %1435 = vmatprep.subr.bf16.mxu1 %v1680_v0 }
 0x222   :  { %1436 = vmatpush3.bf16.msra.mxu1 %v1584_v34 }
 0x223   :  { %1437 = vmatprep.subr.bf16.mxu1 %v1680_v0 }
 0x224   :  { %v1782_v51 = vpop.f32.mrb[4].mxu1  ;;  %v1784_v52 = vpop.f32.mrb[8].mxu0 }
 0x225   :  { %v1786_v53 = vpop.f32.mrb[5].mxu1  ;;  %v1383_v54 = vpop.f32.mrb[9].mxu0  ;;  %v715_v49 = vadd.f32 %v1784_v52, %v261_v46  ;;  %v674_v50 = vadd.f32 %v1782_v51, %v253_v47  ;;  %v990_v51 = vld [vmem:[#allocation6 + $0x2] ss:$0 sm:$0xff] }
 0x226   :  { %v677_v55 = vpop.f32.mrb[6].mxu1  ;;  %v717_v56 = vpop.f32.mrb[10].mxu0  ;;  %1438 = vmatpush3.bf16.msra.mxu1 %v1585_v35 }
 0x227   :  { %v678_v57 = vpop.f32.mrb[7].mxu1  ;;  %v1384_v58 = vpop.f32.mrb[11].mxu0  ;;  %1439 = vmatprep.subr.bf16.mxu1 %v1680_v0 }
 0x228   :  { %v676_v57 = vadd.f32 %v1786_v53, %v257_v48 }
 0x22a   :  { %1440 = vmatpush3.bf16.msra.mxu1 %v1586_v36 }
 0x2e0   :  { %v1403_v9 = vpop.f32.mrb[8].mxu1 }
 0x2e1   :  { %v823_v10 = vpop.f32.mrb[9].mxu1 }
 0x2e2   :  { %v1404_v11 = vpop.f32.mrb[10].mxu1 }
 0x2e3   :  { %v826_v12 = vpop.f32.mrb[11].mxu1 }
 0x2e4   :  { %v837_v13 = vmax.f32 %v823_v10, %v826_v12 }
 0x2e6   :  { %v838_v14 = vmax.f32 %v837_v13, %v1403_v9 }
 0x2e8   :  { %v839_v15 = vsub.f32 %v823_v10, %v838_v14  ;;  %v842_v16 = vsub.f32 %v826_v12, %v838_v14  ;;  %v845_v17 = vsub.f32 %v1403_v9, %v838_v14 }
 0x2ea   :  { %v840_v18 = vmul.f32 1.442695, %v839_v15  ;;  %v843_v19 = vmul.f32 1.442695, %v842_v16  ;;  %v846_v20 = vmul.f32 1.442695, %v845_v17 }
 0x2ec   :  { %1595 = vpow2.f32 %v840_v18 }
 0x2ed   :  { %1597 = vpow2.f32 %v843_v19 }
 0x2ee   :  { %1599 = vpow2.f32 %v846_v20 }
 0x2f6   :  { %v1596_v21 = vpop.eup %1595 }
 0x2f7   :  { %v1598_v23 = vpop.eup %1597 }
 0x2f8   :  { %v848_v24 = vadd.f32 %v1598_v23, %v1596_v21  ;;  %v1600_v26 = vpop.eup %1599 }
 0x2fa   :  { %v849_v27 = vadd.f32 %v1600_v26, %v848_v24 }
 0x2fc   :  { %1601 = vrcp.f32 %v849_v27 }
 0x306   :  { %v1602_v28 = vpop.eup %1601 }
 0x307   :  { %v851_v29 = vmul.f32 %v1602_v28, %v1596_v21  ;;  %v852_v30 = vmul.f32 %v1602_v28, %v1598_v23  ;;  %v853_v31 = vmul.f32 %v1602_v28, %v1600_v26 }
 0x309   :  { %v854_v32 = vpack.c.bf16 %v852_v30, %v851_v29  ;;  %v855_v33 = vpack.c.bf16 %v853_v31, %v853_v31 }
 0x30b   :  { %1421 = vmatprep.mubr.bf16.mxu0 %v854_v32 }
 0x30c   :  { %1422 = vmatmul.mubr.bf16.vlgmr.msra.gmra.mrb[12].mxu0 %v855_v33 }
 0x30d   :  { %1461 = vmatprep.mubr.msk.bf16.mxu0 %vm1681_vm0, %v1680_v0  ;;  %1446 = vmatpush3.bf16.msra.mxu0 %v1587_v37 }
 0x30e   :  { %1447 = vmatprep.subr.bf16.mxu0 %v1680_v0 }
 0x311   :  { %1448 = vmatpush3.bf16.msra.mxu0 %v1588_v38 }
 0x312   :  { %1449 = vmatprep.subr.bf16.mxu0 %v1680_v0 }
 0x315   :  { %1450 = vmatpush3.bf16.msra.mxu0 %v1589_v39 }
 0x316   :  { %1451 = vmatprep.subr.bf16.mxu0 %v1680_v0 }
 0x319   :  { %1452 = vmatpush3.bf16.msra.mxu0 %v1590_v40 }
 0x31a   :  { %1453 = vmatprep.subr.bf16.mxu0 %v1680_v0 }
 0x31d   :  { %1454 = vmatpush3.bf16.msra.mxu0 %v1591_v41 }
 0x31e   :  { %1455 = vmatprep.subr.bf16.mxu0 %v1680_v0 }
 0x321   :  { %1456 = vmatpush3.bf16.msra.mxu0 %v1592_v42 }
 0x322   :  { %1457 = vmatprep.subr.bf16.mxu0 %v1680_v0 }
 0x325   :  { %1458 = vmatpush3.bf16.msra.mxu0 %v1593_v1 }
 0x326   :  { %1459 = vmatprep.subr.bf16.mxu0 %v1680_v0 }
 0x329   :  { %1460 = vmatpush3.bf16.msra.mxu0 %v1594_v25 }
 0x3df   :  { %v1423_v54 = vpop.f32.mrb[12].mxu0 }
 0x3e0   :  { %v971_v55 = vmul.f32 %v1423_v54, %v715_v49  ;;  %v954_v56 = vpop.f32.mrb[13].mxu0 }
 0x3e1   :  { %v968_v58 = vmul.f32 %v954_v56, %v674_v50  ;;  %v1424_v59 = vpop.f32.mrb[14].mxu0 }
 0x3e2   :  { %v957_v60 = vpop.f32.mrb[15].mxu0 }
 0x3e3   :  { %v969_v61 = vmul.f32 %v957_v60, %v676_v57 }
 0x3e5   :  { %v970_v22 = vadd.f32 %v969_v61, %v968_v58 }
 0x3e7   :  { %v972_v62 = vadd.f32 %v971_v55, %v970_v22 }
 0x3e9   :  { %v973_v63 = vpack.c.bf16 %v972_v62, %v972_v62 }
 0x3eb   :  { %1442 = vmatmul.mubr.bf16.vlgmr.msra.gmra.mrb[12].mxu1 %v973_v63 }
 0x4be   :  { %v1073_v52 = vpop.f32.mrb[12].mxu1 }
 0x4bf   :  { %v1074_v2 = vadd.f32 %v1073_v52, %v990_v51  ;;  %v1443_v3 = vpop.f32.mrb[13].mxu1 }
 0x4c0   :  { %v1076_v4 = vpop.f32.mrb[14].mxu1 }
 0x4c1   :  { %v1079_v53 = vmax.f32 %v1074_v2, 0.0  ;;  %v1444_v5 = vpop.f32.mrb[15].mxu1 }
 0x4c3   :  { %v1080_v6 = vpack.c.bf16 %v1079_v53, %v1079_v53 }
 0x4c5   :  { %1462 = vmatmul.mubr.bf16.vlgmr.msra.gmra.mrb[16].mxu0 %v1080_v6 }
 0x598   :  { %v1180_v8 = vpop.f32.mrb[16].mxu0 }
 0x599   :  { %v1181_v9 = vadd.f32 %v1180_v8, %v1097_v7  ;;  %v1463_v10 = vpop.f32.mrb[17].mxu0 }
 0x59a   :  { %v1183_v11 = vpop.f32.mrb[18].mxu0 }
 0x59b   :  { %1186 = vst [vmem:[%s1821_s4] sm:$0xff] %v1181_v9  ;;  %v1464_v0 = vpop.f32.mrb[19].mxu0 }
 0x59c   :  { %1191 = vsyncpa [#allocation3], 1 }
 0x59d   :  { %1192 = vsyncpa [#allocation5], 1 }

</bundles_post_ra>
